<compile_context>
chip_gen: v5e
topology: v5e:2x2
jax: 0.10.0
libtpu: 0.0.40
codegen_flags: <defaults>
</compile_context>

<pallas_src>
import jax
import jax.numpy as jnp
from jax import lax
from jax.experimental import pallas as pl
from jax.experimental.pallas import tpu as pltpu

EPS = 1e-6
LANES = 128                        # TPU lane width; C must divide it.
STATS = 2 * LANES                  # fused [mu | E[x^2]] width
VMEM_LIMIT = 48 * 1024 * 1024      # <= ~48 MiB: safe on v7x (64 MiB physical).


def _gelu(x):
    # Exact (erf) GELU, matching torch.nn.GELU() default.
    return 0.5 * x * (1.0 + lax.erf(x * 0.7071067811865476))


def _round_up(a, b):
    return ((a + b - 1) // b) * b


def _ln_normalize(x, m2):
    """Channel LayerNorm (no affine) in the packed 128-lane layout.

    One bf16 MXU matmul (K = 256) produces [mu | E[x^2]] per pixel group via
    the block-diagonal averaging matrix `m2`; var = E[x^2] - mu^2 (clamped).
    f32 accumulation via preferred_element_type.
    """
    xx = jnp.concatenate([x, x * x], axis=-1).astype(jnp.bfloat16)
    stats = jnp.dot(xx, m2, preferred_element_type=jnp.float32)
    mu = stats[:, :LANES]
    var = jnp.maximum(stats[:, LANES:] - mu * mu, 0.0)
    return (x - mu) * lax.rsqrt(var + EPS)


# --------------------------------------------------------------------------
# Pass 1: accumulate per-image channel sums of LN1(x) over N-tiles.
# (w_in is applied once per image in the XLA finish step, by linearity.)
# --------------------------------------------------------------------------
def _pool_kernel(x_ref, m2_ref, s_ref):
    @pl.when(pl.program_id(1) == 0)
    def _init():
        s_ref[...] = jnp.zeros_like(s_ref)

    x = x_ref[0].astype(jnp.float32)                       # (TR, 128)
    xn = _ln_normalize(x, m2_ref[...])
    s_ref[...] = s_ref[...] + jnp.sum(xn, axis=0, keepdims=True)[None]


# --------------------------------------------------------------------------
# Pass 2: per N-tile -> LN1 + w_in, modulate, w_out, LN2, FC, residual.
# --------------------------------------------------------------------------
def _sfmb_kernel(x_ref, g_ref, m2_ref,
                 win_ref, bin_ref, wout_ref, bout_ref,
                 w1_ref, bb1_ref, w2_ref, bb2_ref,
                 o_ref):
    x = x_ref[0].astype(jnp.float32)                       # (TR, 128)
    m2 = m2_ref[...]

    # norm1 (affine folded into w_in / b_in) + SFRL input conv.
    xn = _ln_normalize(x, m2)
    v = jnp.dot(xn.astype(jnp.bfloat16), win_ref[...],
                preferred_element_type=jnp.float32) + bin_ref[...]

    # Global modulation: gelu(global_mean) was precomputed and lane-tiled.
    z = v * g_ref[0]
    y = jnp.dot(z.astype(jnp.bfloat16), wout_ref[...],
                preferred_element_type=jnp.float32) + bout_ref[...]

    # norm2 (affine folded into w1 / bb1) + FC + residual.
    t = _ln_normalize(y, m2)
    h = _gelu(jnp.dot(t.astype(jnp.bfloat16), w1_ref[...],
                      preferred_element_type=jnp.float32) + bb1_ref[...])
    f = jnp.dot(h.astype(jnp.bfloat16), w2_ref[...],
                preferred_element_type=jnp.float32) + bb2_ref[...]

    o_ref[...] = (f + y)[None].astype(o_ref.dtype)


# --------------------------------------------------------------------------
# Parameter preparation (done once, outside the kernel).
# --------------------------------------------------------------------------
def pack_params(params, dim):
    """Fold LN affines, build block-diagonal packed bf16 weights."""
    assert LANES % dim == 0, f"channel dim {dim} must divide {LANES}"
    P = LANES // dim

    g1 = params["g1"].reshape(dim)
    b1 = params["b1"].reshape(dim)
    g2 = params["g2"].reshape(dim)
    b2 = params["b2"].reshape(dim)

    # Fold LN1 affine into w_in / b_in and LN2 affine into w1 / bb1.
    w_in_e = g1[:, None] * params["w_in"]
    b_in_e = b1 @ params["w_in"] + params["b_in"].reshape(-1)
    w1_e = g2[:, None] * params["w1"]
    bb1_e = b2 @ params["w1"] + params["bb1"].reshape(-1)

    eye = jnp.eye(P, dtype=jnp.float32)
    bd = lambda w: jnp.kron(eye, w.astype(jnp.float32))          # block-diag
    tb = lambda b: jnp.tile(b.reshape(1, -1).astype(jnp.float32), (1, P))

    # Fused LN-stats matrix: blockdiag(m, m) with m the per-pixel averaging
    # matrix (1/dim is exact in bf16 for dim | 128, i.e. a power of two).
    m = bd(jnp.full((dim, dim), 1.0 / dim, jnp.float32))         # (128, 128)
    m2 = jnp.zeros((STATS, STATS), jnp.float32)
    m2 = m2.at[:LANES, :LANES].set(m).at[LANES:, LANES:].set(m)

    return {
        "pack": P,
        "m2": m2.astype(jnp.bfloat16),
        "w_in": bd(w_in_e).astype(jnp.bfloat16),
        "w_in_cc": w_in_e.astype(jnp.float32),       # (C, C) for pass-1 finish
        "b_in_vec": b_in_e.astype(jnp.float32),      # (C,)   for pass-1 finish
        "b_in": tb(b_in_e),
        "w_out": bd(params["w_out"]).astype(jnp.bfloat16),
        "b_out": tb(params["b_out"]),
        "w1": bd(w1_e).astype(jnp.bfloat16),
        "bb1": tb(bb1_e),
        "w2": bd(params["w2"]).astype(jnp.bfloat16),
        "bb2": tb(params["bb2"]),
    }


def _choose_tiling(np_rows, tile_rows=None, target=1024):
    """Sublane-aligned (multiple-of-8) tile and the padded row count it needs.

    Never falls back to "full image": the padded-row overhead is at most
    tile_rows - 1 rows (<= 0.5 MiB of HBM for the default target).
    """
    cap = _round_up(max(np_rows, 1), 8)
    if tile_rows is None:
        tile_rows = min(target, cap)
    tile_rows = max(8, min(_round_up(tile_rows, 8), cap))
    np_pad = _round_up(max(np_rows, 1), tile_rows)
    return tile_rows, np_pad


# --------------------------------------------------------------------------
# Forward pass.
# --------------------------------------------------------------------------
def pruned_sfmb_packed(x_bnc, packed, *, tile_rows=None):
    """Core forward on channels-last x: (B, N=H*W, C) float32 -> same shape."""
    B, N, C = x_bnc.shape
    P = packed["pack"]
    assert P * C == LANES
    hidden_p = packed["w1"].shape[1]              # P * hidden

    # Pad the pixel axis so it packs into an integer number of 8-aligned,
    # tile_rows-sized 128-lane rows.  Zero pixels are exact no-ops for the
    # pooled sums (LN of zeros is zero) and their outputs are sliced off.
    np_rows = (N + P - 1) // P
    tile_rows, np_pad = _choose_tiling(np_rows, tile_rows)
    n_pad = np_pad * P
    if n_pad != N:
        x_bnc = jnp.pad(x_bnc, ((0, 0), (0, n_pad - N), (0, 0)))
    xp = x_bnc.reshape(B, np_pad, LANES)          # free reshape (C contiguous)
    nt = np_pad // tile_rows

    def const(shape):
        return pl.BlockSpec(shape, lambda b, t: (0, 0))

    # ---- pass 1: per-image channel sums of LN1(x) --------------------------
    sums = pl.pallas_call(
        _pool_kernel,
        out_shape=jax.ShapeDtypeStruct((B, 1, LANES), jnp.float32),
        grid_spec=pltpu.PrefetchScalarGridSpec(
            num_scalar_prefetch=0,
            grid=(B, nt),
            in_specs=[
                pl.BlockSpec((1, tile_rows, LANES), lambda b, t: (b, t, 0)),
                const((STATS, STATS)),            # fused LN-stats matrix
            ],
            out_specs=pl.BlockSpec((1, 1, LANES), lambda b, t: (b, 0, 0)),
        ),
        compiler_params=pltpu.CompilerParams(
            dimension_semantics=("parallel", "arbitrary"),
            vmem_limit_bytes=VMEM_LIMIT),
    )(xp, packed["m2"])

    # Tiny per-image finish: combine P packed groups -> mean(LN1(x)), then
    # apply w_in (linearity: mean(LN1(x) @ w_in) = mean(LN1(x)) @ w_in),
    # bias and GELU.  f32 with explicit highest precision.
    mean_xn = sums.reshape(B, P, C).sum(axis=1) / float(N)
    g = jnp.dot(mean_xn, packed["w_in_cc"],
                precision=lax.Precision.HIGHEST) + packed["b_in_vec"][None, :]
    g_packed = jnp.tile(_gelu(g), (1, P)).reshape(B, 1, LANES)

    # ---- pass 2: modulation + w_out + LN2 + FC + residual per N-tile -------
    out = pl.pallas_call(
        _sfmb_kernel,
        out_shape=jax.ShapeDtypeStruct((B, np_pad, LANES), x_bnc.dtype),
        grid_spec=pltpu.PrefetchScalarGridSpec(
            num_scalar_prefetch=0,
            grid=(B, nt),
            in_specs=[
                pl.BlockSpec((1, tile_rows, LANES), lambda b, t: (b, t, 0)),
                pl.BlockSpec((1, 1, LANES), lambda b, t: (b, 0, 0)),   # gelu(g)
                const((STATS, STATS)),                                  # m2
                const((LANES, LANES)), const((1, LANES)),               # w_in,b_in
                const((LANES, LANES)), const((1, LANES)),               # w_out,b_out
                const((LANES, hidden_p)), const((1, hidden_p)),         # w1,bb1
                const((hidden_p, LANES)), const((1, LANES)),            # w2,bb2
            ],
            out_specs=pl.BlockSpec((1, tile_rows, LANES), lambda b, t: (b, t, 0)),
        ),
        compiler_params=pltpu.CompilerParams(
            dimension_semantics=("parallel", "parallel"),
            vmem_limit_bytes=VMEM_LIMIT),
    )(xp, g_packed, packed["m2"],
      packed["w_in"], packed["b_in"], packed["w_out"], packed["b_out"],
      packed["w1"], packed["bb1"], packed["w2"], packed["bb2"])

    return out.reshape(B, n_pad, C)[:, :N, :]


def pruned_sfmb(x_nchw, params, *, tile_rows=None, packed=None):
    """PyTorch-parity entry point: x_nchw (B, C, H, W) -> (B, C, H, W)."""
    B, C, H, W = x_nchw.shape
    if packed is None:
        packed = pack_params(params, C)
    # TODO(synk): in a channels-last end-to-end model these two transposes
    # (each an extra HBM round-trip on a memory-bound block) disappear; kept
    # only to match the PyTorch NCHW interface of this module.
    x = jnp.transpose(x_nchw, (0, 2, 3, 1)).reshape(B, H * W, C)
    y = pruned_sfmb_packed(x, packed, tile_rows=tile_rows)
    return jnp.transpose(y.reshape(B, H, W, C), (0, 3, 1, 2))


# --------------------------------------------------------------------------
# Pure-JAX reference (f32, unfused params) and init.
# --------------------------------------------------------------------------
def pruned_sfmb_ref(x_nchw, params):
    B, C, H, W = x_nchw.shape
    x = jnp.transpose(x_nchw, (0, 2, 3, 1)).reshape(B, H * W, C)

    def ln(v, g, b):
        mu = jnp.mean(v, -1, keepdims=True)
        var = jnp.mean((v - mu) ** 2, -1, keepdims=True)
        return (v - mu) * lax.rsqrt(var + EPS) * g + b

    y = ln(x, params["g1"], params["b1"])
    v = y @ params["w_in"] + params["b_in"]
    g = jnp.mean(v, axis=1, keepdims=True)
    y = (v * _gelu(g)) @ params["w_out"] + params["b_out"]
    t = ln(y, params["g2"], params["b2"])
    f = _gelu(t @ params["w1"] + params["bb1"]) @ params["w2"] + params["bb2"]
    out = f + y
    return jnp.transpose(out.reshape(B, H, W, C), (0, 3, 1, 2))


def init_params(key, dim, ffn_scale=2.0):
    hidden = int(dim * ffn_scale)
    ks = jax.random.split(key, 8)
    s_c = 1.0 / jnp.sqrt(dim)
    s_h = 1.0 / jnp.sqrt(hidden)
    return {
        # LayerNorm affine (torch init: weight=1, bias=0)
        "g1": jnp.ones((1, dim), jnp.float32),
        "b1": jnp.zeros((1, dim), jnp.float32),
        "g2": jnp.ones((1, dim), jnp.float32),
        "b2": jnp.zeros((1, dim), jnp.float32),
        # SFRL 1x1 convs (stored as (in, out) matrices)
        "w_in": jax.random.uniform(ks[0], (dim, dim), jnp.float32, -s_c, s_c),
        "b_in": jax.random.uniform(ks[1], (1, dim), jnp.float32, -s_c, s_c),
        "w_out": jax.random.uniform(ks[2], (dim, dim), jnp.float32, -s_c, s_c),
        "b_out": jax.random.uniform(ks[3], (1, dim), jnp.float32, -s_c, s_c),
        # FC: dim -> hidden -> dim
        "w1": jax.random.uniform(ks[4], (dim, hidden), jnp.float32, -s_c, s_c),
        "bb1": jax.random.uniform(ks[5], (1, hidden), jnp.float32, -s_c, s_c),
        "w2": jax.random.uniform(ks[6], (hidden, dim), jnp.float32, -s_h, s_h),
        "bb2": jax.random.uniform(ks[7], (1, dim), jnp.float32, -s_h, s_h),
    }


if __name__ == "__main__":
    B, C, H, W = 2, 32, 16, 16
    ffn_scale = 2.0

    key = jax.random.PRNGKey(0)
    kx, kp = jax.random.split(key)
    x = jax.random.normal(kx, (B, C, H, W), jnp.float32)
    params = init_params(kp, C, ffn_scale)
    packed = pack_params(params, C)

    ref = jax.block_until_ready(pruned_sfmb_ref(x, params))

    # (a) exact-divisor tiling: Np=64 packed rows, tile 16 -> grid (B, 4).
    out_a = jax.block_until_ready(
        pruned_sfmb(x, params, tile_rows=16, packed=packed))
    # (b) padded tiling: tile 24 -> Np padded 64 -> 72, grid (B, 3).
    out_b = jax.block_until_ready(
        pruned_sfmb(x, params, tile_rows=24, packed=packed))

    assert out_a.shape == (B, C, H, W)
    assert out_b.shape == (B, C, H, W)
    # bf16 matmul operands (incl. fused bf16 LN stats) -> relaxed tolerance
    # vs the pure-f32 reference.
    assert jnp.allclose(out_a, ref, rtol=5e-2, atol=5e-2), "mismatch (tiled)"
    assert jnp.allclose(out_b, ref, rtol=5e-2, atol=5e-2), "mismatch (padded)"
    print("KERNEL_OK")
</pallas_src>

<mosaic_0001>
module attributes {stable_mosaic.version = 11 : i64} {
  func.func @_pool_kernel(%arg0: i32, %arg1: i32, %arg2: memref<1x16x128xf32, #tpu.memory_space<vmem>>, %arg3: memref<256x256xbf16, #tpu.memory_space<vmem>>, %arg4: memref<1x1x128xf32, #tpu.memory_space<vmem>>) attributes {dimension_semantics = [#tpu.dimension_semantics<parallel>, #tpu.dimension_semantics<arbitrary>], iteration_bounds = array<i64: 2, 4>, scalar_prefetch = 0 : i64, scratch_operands = 0 : i64, tpu.core_type = #tpu.core_type<tc>, window_params = [{transform_indices = @transform_0, window_bounds = array<i64: 1, 16, 128>}, {pipeline_mode = #tpu.pipeline_mode<synchronous>, transform_indices = @transform_1, window_bounds = array<i64: 256, 256>}, {transform_indices = @transform_2, window_bounds = array<i64: 1, 1, 128>}]} {
    %c0_i32 = arith.constant 0 : i32
    %0 = arith.cmpi eq, %arg1, %c0_i32 : i32
    %1 = arith.extui %0 : i1 to i32
    %c0_i32_0 = arith.constant 0 : i32
    %2 = arith.cmpi ne, %1, %c0_i32_0 : i32
    scf.if %2 {
      %cst_14 = arith.constant 0.000000e+00 : f32
      %27 = vector.broadcast %cst_14 : f32 to vector<1x1x128xf32>
      %c0_15 = arith.constant 0 : index
      %c0_16 = arith.constant 0 : index
      %c0_17 = arith.constant 0 : index
      %28 = vector.load %arg4[%c0_15, %c0_16, %c0_17] : memref<1x1x128xf32, #tpu.memory_space<vmem>>, vector<1x1x128xf32>
      tpu.vector_store %arg4[%c0_15, %c0_16, %c0_17], %27 {strides = array<i32>} : memref<1x1x128xf32, #tpu.memory_space<vmem>>, vector<1x1x128xf32>,
    } else {
    }
    %c0 = arith.constant 0 : index
    %c0_1 = arith.constant 0 : index
    %c0_2 = arith.constant 0 : index
    %3 = vector.load %arg2[%c0, %c0_1, %c0_2] : memref<1x16x128xf32, #tpu.memory_space<vmem>>, vector<1x16x128xf32>
    %4 = vector.shape_cast %3 : vector<1x16x128xf32> to vector<16x128xf32>
    %c0_3 = arith.constant 0 : index
    %c0_4 = arith.constant 0 : index
    %5 = vector.load %arg3[%c0_3, %c0_4] : memref<256x256xbf16, #tpu.memory_space<vmem>>, vector<256x256xbf16>
    %6 = arith.mulf %4, %4 : vector<16x128xf32>
    %7 = tpu.concatenate %4, %6 in 1 : vector<16x128xf32>, vector<16x128xf32> -> vector<16x256xf32>
    %8 = arith.truncf %7 : vector<16x256xf32> to vector<16x256xbf16>
    %cst = arith.constant dense<0.000000e+00> : vector<16x256xf32>
    %9 = tpu.matmul %8, %5, %cst {dimension_numbers = #tpu.dot_dimension_numbers<[1], [0], [0], [1], [0, 0, 1, 1], [], []>} : vector<16x256xbf16>, vector<256x256xbf16>, vector<16x256xf32> -> vector<16x256xf32>
    %10 = vector.extract_strided_slice %9 {offsets = [0, 0], sizes = [16, 128], strides = [1, 1]} : vector<16x256xf32> to vector<16x128xf32>
    %11 = vector.extract_strided_slice %9 {offsets = [0, 128], sizes = [16, 128], strides = [1, 1]} : vector<16x256xf32> to vector<16x128xf32>
    %12 = arith.mulf %10, %10 : vector<16x128xf32>
    %13 = arith.subf %11, %12 : vector<16x128xf32>
    %cst_5 = arith.constant 0.000000e+00 : f32
    %14 = vector.broadcast %cst_5 : f32 to vector<16x128xf32>
    %15 = arith.maximumf %13, %14 : vector<16x128xf32>
    %16 = arith.subf %4, %10 : vector<16x128xf32>
    %cst_6 = arith.constant 9.99999997E-7 : f32
    %17 = vector.broadcast %cst_6 : f32 to vector<16x128xf32>
    %18 = arith.addf %15, %17 : vector<16x128xf32>
    %19 = math.rsqrt %18 : vector<16x128xf32>
    %20 = arith.mulf %16, %19 : vector<16x128xf32>
    %c0_7 = arith.constant 0 : index
    %c0_8 = arith.constant 0 : index
    %c0_9 = arith.constant 0 : index
    %21 = vector.load %arg4[%c0_7, %c0_8, %c0_9] : memref<1x1x128xf32, #tpu.memory_space<vmem>>, vector<1x1x128xf32>
    %cst_10 = arith.constant dense<0.000000e+00> : vector<128xf32>
    %22 = vector.multi_reduction <add>, %20, %cst_10 [0] : vector<16x128xf32> to vector<128xf32>
    %23 = vector.shape_cast %22 : vector<128xf32> to vector<1x128xf32>
    %24 = vector.shape_cast %23 : vector<1x128xf32> to vector<1x1x128xf32>
    %25 = arith.addf %21, %24 : vector<1x1x128xf32>
    %c0_11 = arith.constant 0 : index
    %c0_12 = arith.constant 0 : index
    %c0_13 = arith.constant 0 : index
    %26 = vector.load %arg4[%c0_11, %c0_12, %c0_13] : memref<1x1x128xf32, #tpu.memory_space<vmem>>, vector<1x1x128xf32>
    tpu.vector_store %arg4[%c0_11, %c0_12, %c0_13], %25 {strides = array<i32>} : memref<1x1x128xf32, #tpu.memory_space<vmem>>, vector<1x1x128xf32>,
    return
  }
  func.func @transform_0(%arg0: i32, %arg1: i32) -> (i32, i32, i32) {
    %c0_i32 = arith.constant 0 : i32
    %c0_i32_0 = arith.constant 0 : i32
    return %arg0, %arg1, %c0_i32 : i32, i32, i32
  }
  func.func @transform_1(%arg0: i32, %arg1: i32) -> (i32, i32) {
    %c0_i32 = arith.constant 0 : i32
    %c0_i32_0 = arith.constant 0 : i32
    %c0_i32_1 = arith.constant 0 : i32
    return %c0_i32, %c0_i32_0 : i32, i32
  }
  func.func @transform_2(%arg0: i32, %arg1: i32) -> (i32, i32, i32) {
    %c0_i32 = arith.constant 0 : i32
    %c0_i32_0 = arith.constant 0 : i32
    %c0_i32_1 = arith.constant 0 : i32
    return %arg0, %c0_i32, %c0_i32_0 : i32, i32, i32
  }
}

</mosaic_0001>

<bundles_post_ra>
// kernel: tpu_custom_call.1
= control target key start
LH: loop header
LB: loop body
LE: loop exit
PB: predicated region body
PF: predicated region fallthrough
CT: control target
= control target key end

     0   :  { %s1330_s0 = inlined_call_operand.hbm [shape: f32[2,64,128], index: 0, kind: input, shape index: {}]   ;;  %s1331_s1 = inlined_call_operand.hbm [shape: bf16[256,256], index: 1, kind: input, shape index: {}]   ;;  %s1332_s2 = inlined_call_operand.hbm [shape: f32[2,1,128], index: 2, kind: output, shape index: {}]  }
   0x1   :  { %1342 = sst [smem:[#allocation17_spill]] %s1331_s1 }
   0x2   :  { %1343 = sst [smem:[#allocation18_spill]] %s1332_s2 }
   0x3   :  { %7 = vsyncpa [#allocation3], 0 }
   0x4   :  { %9 = vsyncpa [#allocation3 + $0x1], 0 }
   0x5   :  { %10 = vsyncpa [#allocation6], 0 }
   0x6   :  { %11 = vsyncpa [#allocation4], 0 }
   0x7   :  { %13 = vsyncpa [#allocation4 + $0x1], 0  ;;  %s1103_s9 = smov 0   ;;  %s1105_s10 = smov 0  }
   0x8   :  { %s1107_s11 = smov 0   ;;  %s1109_s12 = smov 0  }
   0x9   :  { %s1111_s13 = smov 0   ;;  %s1113_s14 = smov 0  }
   0xa   :  { %s1115_s15 = smov 0   ;;  %s1117_s16 = smov 0  }
   0xb   :  { %s1119_s17 = smov 0   ;;  %s1121_s18 = smov 0  }
   0xc   :  { %s1123_s19 = smov 0  }
   0xd LB: > { %1344 = sst [smem:[#allocation11_spill]] %s1042_s9  ;;  %s601_s20 = sadd.s32 4294967295, %s1082_s19   ;;  %s1082_s19 = sphi %s1123_s19, %s19_s19   ;;  %s1078_s18 = sphi %s1121_s18, %s1375_s18   ;;  %s1074_s17 = sphi %s1119_s17, %s1374_s17   ;;  %s1070_s16 = sphi %s1117_s16, %s1373_s16   ;;  %s1066_s15 = sphi %s1115_s15, %s1372_s15   ;;  %s1062_s14 = sphi %s1113_s14, %s1371_s14   ;;  %s1058_s13 = sphi %s1111_s13, %s1370_s13   ;;  %s1054_s12 = sphi %s1109_s12, %s1369_s12   ;;  %s1050_s11 = sphi %s1107_s11, %s1368_s11   ;;  %s1046_s10 = sphi %s1105_s10, %s1367_s10   ;;  %s1042_s9 = sphi %s1103_s9, %s1366_s9  }
   0xe   : > { %1345 = sst [smem:[#allocation12_spill]] %s1070_s16  ;;  %s602_s21 = sadd.s32 4294967294, %s1082_s19  }
   0xf   : > { %p53_p0 = scmp.ne.s32.totalorder %s1058_s13, %s1054_s12  ;;  %p1159_p1 = scmp.eq.s32.totalorder %s601_s20, 0 }
  0x10   : > { %p97_p2 = scmp.ne.s32.totalorder %s1050_s11, %s1046_s10  ;;  %p98_p3 = scmp.eq.s32.totalorder %s601_s20, 7 }
  0x11   : > { %p1167_p4 = por %p1159_p1, %p53_p0  ;;  %p103_p5 = scmp.ne.s32.totalorder %s1046_s10, %s1042_s9 }
  0x12   : > { %p1173_p6 = por %p98_p3, %p97_p2  ;;  %p104_p7 = scmp.eq.s32.totalorder %s602_s21, 7 }
  0x13   : > { %p603_p8 = scmp.ge.s32.totalorder %s1082_s19, 1  ;;  %p111_p9 = scmp.lt.s32.totalorder %s1082_s19, 9 }
  0x14   : > { %s1348_s24 = scalar_select %p1173_p6, 1, 0 }
  0x15   : > { %p1179_p10 = por %p104_p7, %p103_p5  ;;  %p1183_p11 = pnand %p603_p8, %p111_p9 }
  0x16   : > { %1349 = sst [smem:[#allocation13_spill]] %s1348_s24  ;;  %s1084_s30 = smov [#allocation5]  }
  0x17   : > { %s1350_s25 = scalar_select %p1179_p10, 1, 0 }
  0x18   : > { %s1353_s1 = sld [smem:[#allocation17_spill]]  ;;  %p784_p12 = pneg %p1183_p11 }
  0x19   : > { %1351 = sst [smem:[#allocation14_spill]] %s1350_s25  ;;  %s124_s3 = sshll.u32 %s1084_s30, 4  ;;  %s125_s3 = int_to_ptr.vmem [resolvable:$true] %s124_s3 }
  0x1a   : > { %p785_p13 = pnand %p784_p12, %p1159_p1  ;;  %s1333_s4 = smov 128  }
  0x1b   : > { %s1334_s5 = smov 8   ;;  %s28_s6 = sadd.s32 1, %s1074_s17 }
  0x1c   : > { %p29_p0 = scmp.ge.s32.totalorder %s28_s6, 4  ;;  %s31_s7 = sadd.s32 1, %s1078_s18 }
  0x1d   : > { %p47_p2 = scmp.ne.s32.totalorder %s1062_s14, %s1058_s13  ;;  %p48_p3 = scmp.eq.s32.totalorder %s1082_s19, 0 }
  0x1e   : > { %s122_s29 = sshll.u32 %s1353_s1, 4  ;;  %s1377_s6 = smov (%p29_p0, %s28_s6), 0  ;;  %s123_s29 = int_to_ptr.hbm [resolvable:$true] %s122_s29 }
  0x1f   : > { %787 = dma.hbm_to_vmem [thread:$0]  (!%p785_p13), %s123_s29, 4096, %s125_s3, [#allocation6], %s1333_s4, %s1333_s4, %s1334_s5  }
  0x20   : > { %1354 = sst [smem:[#allocation15_spill]] %s1377_s6  ;;  %s1379_s7 = smov (!%p29_p0, %s31_s7), %s1078_s18 }
  0x21   : > { %s36_s8 = ssub.s32 %s1074_s17, %s1377_s6  ;;  %s40_s12 = sadd.s32 1, %s1062_s14 }
  0x22   : > { %p33_p5 = scmp.ge.s32.totalorder %s1379_s7, 2  ;;  %p1208_p7 = por %p48_p3, %p47_p2 }
  0x23   : > { %s87_s21 = sadd.s32 1, %s1050_s11  ;;  %s138_s27 = sand.u32 1, %s1062_s14  }
  0x24   : > { %s1381_s7 = smov (%p33_p5, %s1379_s7), 0  ;;  %p797_p8 = scmp.lt.s32.totalorder %s1082_s19, 8 }
  0x25   : > { %1356 = sst [smem:[#allocation16_spill]] %s1381_s7  ;;  %s606_s28 = sshll.u32 %s138_s27, 4 }
  0x26   : > { %s35_s29 = ssub.s32 %s1078_s18, %s1381_s7  ;;  %s607_s3 = sshll.u32 %s1074_s17, 1 }
  0x27   : > { %s37_s30 = sor.u32 %s36_s8, %s35_s29  ;;  %p85_p9 = scmp.eq.s32.totalorder %s35_s29, 0 }
  0x28   : > { %p38_p12 = scmp.eq.s32.totalorder %s37_s30, 0  ;;  %s608_s1 = sshll.u32 %s1078_s18, 3 }
  0x29   : > { %s1221_s4 = scalar_select %p85_p9, %s1050_s11, %s87_s21  }
  0x2a   : > { %s1224_s5 = scalar_select %p38_p12, %s1062_s14, %s40_s12  }
  0x2b   : > { %s142_s6 = scalar_lea.vmem [#allocation2], %s606_s28  ;;  %s147_s9 = sadd.s32 %s608_s1, %s607_s3 }
  0x2c   : > { %s152_s25 = sshll.u32 %s142_s6, 4  ;;  %s609_s24 = sshll.u32 %s147_s9, 3  ;;  %s153_s25 = int_to_ptr.vmem [resolvable:$true] %s152_s25 }
  0x2d   : > { %p789_p13 = pnand %p797_p8, %p1208_p7  ;;  %s149_s7 = scalar_lea.hbm %s1330_s0, %s609_s24 }
  0x2e   : > { %s150_s8 = sshll.u32 %s149_s7, 4  ;;  %s139_s29 = scalar_lea.sflag [#allocation3], %s138_s27  ;;  %s151_s8 = int_to_ptr.hbm [resolvable:$true] %s150_s8 }
  0x2f   : > { %s1357_s21 = smov 8   ;;  %s1358_s30 = smov 128  }
  0x30   : > { %791 = dma.hbm_to_vmem [thread:$0]  (!%p789_p13), %s151_s8, 256, %s153_s25, %s139_s29, %s1358_s30, %s1358_s30, %s1357_s21  }
  0x31   : > { %164 = sbr.rel (%p1183_p11) target bundleno = 289 (0x121), region = 28  ;;  %s166_s1 = sand.u32 (!%p1183_p11), 1, %s1058_s13  }
  0x32   : > { %s1240_s9 = sshll.u32 (!%p1183_p11), %s166_s1, 4  ;;  %s167_s6 = scalar_lea.sflag (!%p1183_p11), [#allocation3], %s166_s1 }
  0x33   : > { %s170_s2 = scalar_lea.vmem (!%p1183_p11), [#allocation2], %s1240_s9 }
  0x36   : > { %1029 = dma.done.wait (%p1167_p4), %s167_s6, 256  }
  0x37   : > { %1031 = vsyncadd (%p1167_p4), %s167_s6, 4294967040 }
  0x38   : > { %1033 = dma.done.wait (%p1159_p1), [#allocation6], 4096  }
  0x39   : > { %1035 = vsyncadd (%p1159_p1), [#allocation6], 4294963200  ;;  %s194_s16 = sand.u32 1, %s1046_s10   ;;  %p613_p11 = scmp.ne.s32.totalorder %s1066_s15, 0 }
  0x3a   : > { %s1254_s24 = scalar_lea.vmem [#allocation7], %s194_s16 }
  0x3b   : > { %200 = sbr.rel (%p613_p11) target bundleno = 66 (0x42), region = 40 }
  0x40   : > { %v1087_v0 = vmov 0.0  }
  0x41   : > { %201 = vst [vmem:[%s1254_s24] sm:$0x1] %v1087_v0 }
  0x42 PF: > { %v672_v1 = vld [vmem:[#allocation5 + $0x70] sm:$0xf]  ;;  %v759_v2 = vld [vmem:[#allocation5 + $0x74] sm:$0xf0]  ;;  %v758_v6 = vld [vmem:[#allocation5 + $0x74] sm:$0xf] }
  0x43   : > { %v736_v3 = vld [vmem:[#allocation5 + $0xf0] sm:$0xf]  ;;  %v673_v4 = vor.u32 %v759_v2, %v672_v1  ;;  %v775_v5 = vld [vmem:[#allocation5 + $0xf4] sm:$0xf0]  ;;  %v674_v7 = vld [vmem:[#allocation5 + $0x78] sm:$0xf0] }
  0x44   : > { %v737_v8 = vor.u32 %v775_v5, %v736_v3  ;;  %v677_v9 = vor.u32 %v758_v6, %v674_v7  ;;  %v774_v10 = vld [vmem:[#allocation5 + $0xf4] sm:$0xf]  ;;  %v738_v11 = vld [vmem:[#allocation5 + $0xf8] sm:$0xf0]  ;;  %v664_v12 = vld [vmem:[#allocation5 + $0x60] sm:$0xf] }
  0x45   : > { %400 = vmatpush.bf16.msra.mxu0 %v673_v4  ;;  %v741_v13 = vor.u32 %v774_v10, %v738_v11  ;;  %v757_v14 = vld [vmem:[#allocation5 + $0x64] sm:$0xf0]  ;;  %v728_v15 = vld [vmem:[#allocation5 + $0xe0] sm:$0xf]  ;;  %v756_v19 = vld [vmem:[#allocation5 + $0x64] sm:$0xf] }
  0x46   : > { %v773_v16 = vld [vmem:[#allocation5 + $0xe4] sm:$0xf0]  ;;  %414 = vmatpush.bf16.msra.mxu1 %v737_v8  ;;  %428 = vmatpush.bf16.msra.mxu2 %v677_v9  ;;  %v665_v17 = vor.u32 %v757_v14, %v664_v12  ;;  %v666_v20 = vld [vmem:[#allocation5 + $0x68] sm:$0xf0]  ;;  %v772_v21 = vld [vmem:[#allocation5 + $0xe4] sm:$0xf] }
  0x47   : > { %v729_v18 = vor.u32 %v773_v16, %v728_v15  ;;  %442 = vmatpush.bf16.msra.mxu3 %v741_v13  ;;  %v669_v22 = vor.u32 %v756_v19, %v666_v20  ;;  %v730_v23 = vld [vmem:[#allocation5 + $0xe8] sm:$0xf0]  ;;  %v656_v24 = vld [vmem:[#allocation5 + $0x50] sm:$0xf]  ;;  %v755_v25 = vld [vmem:[#allocation5 + $0x54] sm:$0xf0] }
  0x48   : > { %v733_v26 = vor.u32 %v772_v21, %v730_v23  ;;  %v720_v27 = vld [vmem:[#allocation5 + $0xd0] sm:$0xf]  ;;  %v771_v28 = vld [vmem:[#allocation5 + $0xd4] sm:$0xf0]  ;;  %v754_v29 = vld [vmem:[#allocation5 + $0x54] sm:$0xf]  ;;  %v657_v30 = vor.u32 %v755_v25, %v656_v24 }
  0x49   : > { %401 = vmatpush.bf16.msra.mxu0 %v665_v17  ;;  %v658_v31 = vld [vmem:[#allocation5 + $0x58] sm:$0xf0]  ;;  %v770_v32 = vld [vmem:[#allocation5 + $0xd4] sm:$0xf]  ;;  %v721_v34 = vor.u32 %v771_v28, %v720_v27  ;;  %v648_v36 = vld [vmem:[#allocation5 + $0x40] sm:$0xf] }
  0x4a   : > { %v722_v33 = vld [vmem:[#allocation5 + $0xd8] sm:$0xf0]  ;;  %415 = vmatpush.bf16.msra.mxu1 %v729_v18  ;;  %429 = vmatpush.bf16.msra.mxu2 %v669_v22  ;;  %v661_v35 = vor.u32 %v754_v29, %v658_v31  ;;  %v753_v37 = vld [vmem:[#allocation5 + $0x44] sm:$0xf0]  ;;  %v712_v38 = vld [vmem:[#allocation5 + $0xc0] sm:$0xf] }
  0x4b   : > { %443 = vmatpush.bf16.msra.mxu3 %v733_v26  ;;  %v725_v39 = vor.u32 %v770_v32, %v722_v33  ;;  %v769_v40 = vld [vmem:[#allocation5 + $0xc4] sm:$0xf0]  ;;  %v752_v41 = vld [vmem:[#allocation5 + $0x44] sm:$0xf]  ;;  %v650_v42 = vld [vmem:[#allocation5 + $0x48] sm:$0xf0]  ;;  %v649_v45 = vor.u32 %v753_v37, %v648_v36 }
  0x4c   : > { %v768_v43 = vld [vmem:[#allocation5 + $0xc4] sm:$0xf]  ;;  %v714_v44 = vld [vmem:[#allocation5 + $0xc8] sm:$0xf0]  ;;  %v713_v46 = vor.u32 %v769_v40, %v712_v38  ;;  %v653_v47 = vor.u32 %v752_v41, %v650_v42  ;;  %v640_v48 = vld [vmem:[#allocation5 + $0x30] sm:$0xf] }
  0x4d   : > { %402 = vmatpush.bf16.msra.mxu0 %v657_v30  ;;  %v751_v49 = vld [vmem:[#allocation5 + $0x34] sm:$0xf0]  ;;  %v704_v50 = vld [vmem:[#allocation5 + $0xb0] sm:$0xf]  ;;  %v717_v51 = vor.u32 %v768_v43, %v714_v44  ;;  %v750_v53 = vld [vmem:[#allocation5 + $0x34] sm:$0xf] }
  0x4e   : > { %416 = vmatpush.bf16.msra.mxu1 %v721_v34  ;;  %430 = vmatpush.bf16.msra.mxu2 %v661_v35  ;;  %v767_v52 = vld [vmem:[#allocation5 + $0xb4] sm:$0xf0]  ;;  %v642_v54 = vld [vmem:[#allocation5 + $0x38] sm:$0xf0]  ;;  %v766_v55 = vld [vmem:[#allocation5 + $0xb4] sm:$0xf]  ;;  %v641_v57 = vor.u32 %v751_v49, %v640_v48 }
  0x4f   : > { %444 = vmatpush.bf16.msra.mxu3 %v725_v39  ;;  %v706_v56 = vld [vmem:[#allocation5 + $0xb8] sm:$0xf0]  ;;  %v705_v58 = vor.u32 %v767_v52, %v704_v50  ;;  %v645_v59 = vor.u32 %v750_v53, %v642_v54  ;;  %v632_v60 = vld [vmem:[#allocation5 + $0x20] sm:$0xf]  ;;  %v749_v61 = vld [vmem:[#allocation5 + $0x24] sm:$0xf0] }
  0x50   : > { %v696_v62 = vld [vmem:[#allocation5 + $0xa0] sm:$0xf]  ;;  %v709_v63 = vor.u32 %v766_v55, %v706_v56  ;;  %v765_v0 = vld [vmem:[#allocation5 + $0xa4] sm:$0xf0]  ;;  %v748_v1 = vld [vmem:[#allocation5 + $0x24] sm:$0xf]  ;;  %v633_v5 = vor.u32 %v749_v61, %v632_v60 }
  0x51   : > { %403 = vmatpush.bf16.msra.mxu0 %v649_v45  ;;  %v634_v2 = vld [vmem:[#allocation5 + $0x28] sm:$0xf0]  ;;  %v764_v3 = vld [vmem:[#allocation5 + $0xa4] sm:$0xf]  ;;  %v697_v6 = vor.u32 %v765_v0, %v696_v62  ;;  %v624_v8 = vld [vmem:[#allocation5 + $0x10] sm:$0xf] }
  0x52   : > { %417 = vmatpush.bf16.msra.mxu1 %v713_v46  ;;  %431 = vmatpush.bf16.msra.mxu2 %v653_v47  ;;  %v698_v4 = vld [vmem:[#allocation5 + $0xa8] sm:$0xf0]  ;;  %v637_v7 = vor.u32 %v748_v1, %v634_v2  ;;  %v747_v9 = vld [vmem:[#allocation5 + $0x14] sm:$0xf0]  ;;  %v688_v10 = vld [vmem:[#allocation5 + $0x90] sm:$0xf] }
  0x53   : > { %445 = vmatpush.bf16.msra.mxu3 %v717_v51  ;;  %v701_v11 = vor.u32 %v764_v3, %v698_v4  ;;  %v763_v12 = vld [vmem:[#allocation5 + $0x94] sm:$0xf0]  ;;  %v746_v13 = vld [vmem:[#allocation5 + $0x14] sm:$0xf]  ;;  %v626_v14 = vld [vmem:[#allocation5 + $0x18] sm:$0xf0]  ;;  %v625_v17 = vor.u32 %v747_v9, %v624_v8 }
  0x54   : > { %v762_v15 = vld [vmem:[#allocation5 + $0x94] sm:$0xf]  ;;  %v690_v16 = vld [vmem:[#allocation5 + $0x98] sm:$0xf0]  ;;  %v616_v18 = vld [vmem:[#allocation5] sm:$0xf]  ;;  %v689_v20 = vor.u32 %v763_v12, %v688_v10  ;;  %v629_v21 = vor.u32 %v746_v13, %v626_v14 }
  0x55   : > { %404 = vmatpush.bf16.msra.mxu0 %v641_v57  ;;  %v745_v19 = vld [vmem:[#allocation5 + $0x4] sm:$0xf0]  ;;  %v680_v22 = vld [vmem:[#allocation5 + $0x80] sm:$0xf]  ;;  %v693_v25 = vor.u32 %v762_v15, %v690_v16  ;;  %v744_v27 = vld [vmem:[#allocation5 + $0x4] sm:$0xf] }
  0x56   : > { %418 = vmatpush.bf16.msra.mxu1 %v705_v58  ;;  %432 = vmatpush.bf16.msra.mxu2 %v645_v59  ;;  %v1260_v23 = vld [vmem:[%s170_s2] sm:$0xff]  ;;  %v1264_v24 = vld [vmem:[%s170_s2 + $0x8] sm:$0xff]  ;;  %v617_v31 = vor.u32 %v745_v19, %v616_v18  ;;  %s1359_s15 = sld [smem:[#allocation12_spill]]  ;;  %s509_s12 = sshll.u32 %s1254_s24, 4  ;;  %s510_s12 = int_to_ptr.vmem [resolvable:$true] %s509_s12 }
  0x57   : > { %446 = vmatpush.bf16.msra.mxu3 %v709_v63  ;;  %v761_v26 = vld [vmem:[#allocation5 + $0x84] sm:$0xf0]  ;;  %v618_v28 = vld [vmem:[#allocation5 + $0x8] sm:$0xf0]  ;;  %v760_v29 = vld [vmem:[#allocation5 + $0x84] sm:$0xf]  ;;  %v236_v32 = vmul.f32 %v1260_v23, %v1260_v23  ;;  %v237_v33 = vmul.f32 %v1264_v24, %v1264_v24  ;;  %v238_v37 = vpack.c.bf16 %v1264_v24, %v1260_v23 }
  0x58   : > { %v682_v30 = vld [vmem:[#allocation5 + $0x88] sm:$0xf0]  ;;  %v681_v34 = vor.u32 %v761_v26, %v680_v22  ;;  %v621_v35 = vor.u32 %v744_v27, %v618_v28  ;;  %s1360_s25 = sld [smem:[#allocation18_spill]]  ;;  %v488_v19 = vld [vmem:[%s1254_s24] sm:$0x1]  ;;  %s499_s27 = scalar_lea.sflag [#allocation4], %s194_s16 }
  0x59   : > { %405 = vmatpush.bf16.msra.mxu0 %v633_v5  ;;  %v685_v36 = vor.u32 %v760_v29, %v682_v30  ;;  %v239_v38 = vpack.c.bf16 %v237_v33, %v236_v32 }
  0x5a   : > { %419 = vmatpush.bf16.msra.mxu1 %v697_v6  ;;  %433 = vmatpush.bf16.msra.mxu2 %v637_v7 }
  0x5b   : > { %447 = vmatpush.bf16.msra.mxu3 %v701_v11 }
  0x5d   : > { %406 = vmatpush.bf16.msra.mxu0 %v625_v17 }
  0x5e   : > { %420 = vmatpush.bf16.msra.mxu1 %v689_v20  ;;  %434 = vmatpush.bf16.msra.mxu2 %v629_v21  ;;  %s507_s7 = scalar_lea.hbm %s1360_s25, %s1359_s15  ;;  %s976_s21 = scalar_lea.hbm %s1360_s25, 2 }
  0x5f   : > { %448 = vmatpush.bf16.msra.mxu3 %v693_v25  ;;  %s511_s20 = sshll.u32 %s507_s7, 4  ;;  %s512_s20 = int_to_ptr.hbm [resolvable:$true] %s511_s20 }
  0x60   : > { %s970_s28 = sshra.s32 %s512_s20, 4  ;;  %s971_s28 = int_to_ptr.hbm [resolvable:$true] %s970_s28 }
  0x61   : > { %407 = vmatpush.bf16.msra.mxu0 %v617_v31  ;;  %s972_s3 = scalar_lea.hbm %s971_s28, 1  ;;  %p977_p2 = scmp.lt.s32.totalorder %s971_s28, %s1360_s25 }
  0x62   : > { %421 = vmatpush.bf16.msra.mxu1 %v681_v34  ;;  %435 = vmatpush.bf16.msra.mxu2 %v621_v35  ;;  %p973_p1 = scmp.ne.s32.totalorder %s971_s28, %s972_s3  ;;  %p978_p3 = scmp.lt.s32.totalorder %s976_s21, %s972_s3 }
  0x63   : > { %449 = vmatpush.bf16.msra.mxu3 %v685_v36 }
  0x64   : > { %408 = vmatmul.bf16.vlgmr.msra.gmra.mxu0 %v238_v37  ;;  %p974_p4 = pnand %p973_p1, %p1173_p6  ;;  %p979_p5 = por %p978_p3, %p977_p2 }
  0x65   : > { %422 = vmatmul.bf16.vlgmr.msra.gmra.mxu1 %v239_v38  ;;  %436 = vmatmul.bf16.vlgmr.msra.gmra.mxu2 %v238_v37 }
  0x66   : > { %450 = vmatmul.bf16.vlgmr.msra.gmra.mxu3 %v239_v38  ;;  %p975_p0 = pneg %p974_p4 }
  0x68   : > { %p980_p7 = pnand %p979_p5, %p975_p0 }
  0xe1   : > { %v409_v39 = vpop.f32.mrf.mxu0 }
  0xe2   : > { %v423_v40 = vpop.f32.mrf.mxu1 }
  0xe3   : > { %v424_v41 = vadd.f32 %v423_v40, %v409_v39 }
  0xe5   : > { %v456_v42 = vmul.f32 %v424_v41, %v424_v41  ;;  %v462_v8 = vsub.f32 %v1260_v23, %v424_v41 }
  0xe8   : > { %v437_v43 = vpop.f32.mrf.mxu2 }
  0xe9   : > { %v451_v44 = vpop.f32.mrf.mxu3  ;;  %v411_v46 = vpop.f32.mrf.mxu0 }
  0xea   : > { %v452_v45 = vadd.f32 %v451_v44, %v437_v43  ;;  %v425_v47 = vpop.f32.mrf.mxu1 }
  0xeb   : > { %v426_v50 = vadd.f32 %v425_v47, %v411_v46 }
  0xec   : > { %v458_v48 = vsub.f32 %v452_v45, %v456_v42 }
  0xed   : > { %v457_v54 = vmul.f32 %v426_v50, %v426_v50  ;;  %v463_v9 = vsub.f32 %v1264_v24, %v426_v50 }
  0xee   : > { %v460_v49 = vmax.f32 %v458_v48, 0.0 }
  0xf0   : > { %v464_v51 = vadd.f32 1e-06, %v460_v49  ;;  %v439_v52 = vpop.f32.mrf.mxu2 }
  0xf1   : > { %v453_v53 = vpop.f32.mrf.mxu3 }
  0xf2   : > { %892 = vrsqrt.f32 %v464_v51  ;;  %v454_v55 = vadd.f32 %v453_v53, %v439_v52  ;;  %vm472_vm1 = vweird.f32 %v464_v51 }
  0xf4   : > { %v459_v56 = vsub.f32 %v454_v55, %v457_v54 }
  0xf6   : > { %v461_v57 = vmax.f32 %v459_v56, 0.0 }
  0xf8   : > { %v893_v58 = vpop.eup %892  ;;  %v465_v59 = vadd.f32 1e-06, %v461_v57 }
  0xf9   : > { %v467_v60 = vmul.f32 %v893_v58, %v464_v51  ;;  %vm473_vm0 = vweird.f32 %v893_v58 }
  0xfa   : > { %894 = vrsqrt.f32 %v465_v59  ;;  %vm474_vm3 = vmor %vm472_vm1, %vm473_vm0  ;;  %vm482_vm4 = vweird.f32 %v465_v59 }
  0xfb   : > { %v468_v61 = vmul.f32 %v893_v58, %v467_v60 }
  0xfd   : > { %v469_v62 = vmul.f32 0.5, %v468_v61 }
  0xff   : > { %v470_v0 = vsub.f32 1.5, %v469_v62 }
 0x100   : > { %v895_v63 = vpop.eup %894 }
 0x101   : > { %v477_v1 = vmul.f32 %v895_v63, %v465_v59  ;;  %v471_v3 = vmul.f32 %v893_v58, %v470_v0  ;;  %vm483_vm2 = vweird.f32 %v895_v63 }
 0x102   : > { %vm484_vm5 = vmor %vm482_vm4, %vm483_vm2 }
 0x103   : > { %v478_v2 = vmul.f32 %v895_v63, %v477_v1  ;;  %v475_v6 = vsel %vm474_vm3, %v893_v58, %v471_v3 }
 0x104   : > { %v486_v11 = vmul.f32 %v475_v6, %v462_v8 }
 0x105   : > { %v479_v4 = vmul.f32 0.5, %v478_v2 }
 0x107   : > { %v480_v5 = vsub.f32 1.5, %v479_v4 }
 0x109   : > { %v481_v7 = vmul.f32 %v895_v63, %v480_v5 }
 0x10b   : > { %v485_v10 = vsel %vm484_vm5, %v895_v63, %v481_v7 }
 0x10c   : > { %v487_v12 = vmul.f32 %v485_v10, %v463_v9 }
 0x10e   : > { %v489_v13 = vadd.f32 %v487_v12, %v486_v11 }
 0x110   : > { %v490_v14 = vrot.slane %v489_v13, 4 }
 0x112   : > { %v491_v15 = vadd.f32 %v490_v14, %v489_v13 }
 0x114   : > { %v492_v16 = vrot.slane %v491_v15, 2 }
 0x116   : > { %v493_v17 = vadd.f32 %v492_v16, %v491_v15 }
 0x118   : > { %v494_v18 = vrot.slane %v493_v17, 1 }
 0x11a   : > { %v495_v20 = vadd.f32 %v494_v18, %v493_v17 }
 0x11c   : > { %v496_v21 = vadd.f32 %v495_v20, %v488_v19 }
 0x11e   : > { %497 = vst [vmem:[%s1254_s24] sm:$0x1] %v496_v21 }
 0x11f   : > { %983 = shalt.err (!%p980_p7)
}
 0x120   : > { %782 = dma.vmem_to_hbm [thread:$0]  (%p1173_p6), %s510_s12, 16, %s512_s20, %s499_s27  }
 0x121 PF: > { %s1362_s9 = sld [smem:[#allocation11_spill]]  ;;  %p799_p8 = scmp.ge.s32.totalorder %s1082_s19, 2 }
 0x123   : > { %p793_p9 = pnand %p799_p8, %p1179_p10 }
 0x125   : > { %p794_p12 = pneg %p793_p9 }
 0x127   : > { %s523_s2 = sand.u32 1, %s1362_s9  }
 0x128   : > { %s524_s16 = scalar_lea.sflag [#allocation4], %s523_s2 }
 0x129   : > { %1037 = dma.done.wait (%p794_p12), %s524_s16, 16  }
 0x12a   : > { %1039 = vsyncadd (%p794_p12), %s524_s16, 4294967280  ;;  %s19_s19 = sadd.s32 1, %s1082_s19   ;;  %s1364_s24 = sld [smem:[#allocation15_spill]] }
 0x12b   : > { %p16_p13 = scmp.ge.s32.totalorder %s19_s19, 10   ;;  %s1365_s22 = sld [smem:[#allocation16_spill]] }
 0x12c   : > { %s1366_s9 = smov %s1046_s10  ;;  %s1367_s10 = smov %s1050_s11 }
 0x12d   : > { %s1368_s11 = smov %s1221_s4  ;;  %s1369_s12 = smov %s1058_s13 }
 0x12e   : > { %s1370_s13 = smov %s1062_s14  ;;  %s1371_s14 = smov %s1224_s5 }
 0x12f   : > { %s1372_s15 = smov %s1074_s17  ;;  %s1373_s16 = smov %s1078_s18 }
 0x130   : > { %s1374_s17 = smov %s1364_s24  ;;  %18 = sbr.rel (!%p16_p13) target bundleno = 13 (0xd), region = 81 }
 0x131   : > { %s1375_s18 = smov %s1365_s22 }
 0x135   :  { %529 = vsyncpa [#allocation3], 1 }
 0x136   :  { %531 = vsyncpa [#allocation3 + $0x1], 1 }
 0x137   :  { %532 = vsyncpa [#allocation6], 1 }
 0x138   :  { %533 = vsyncpa [#allocation4], 1 }
 0x139   :  { %535 = vsyncpa [#allocation4 + $0x1], 1 }

</bundles_post_ra>
